<compile_context>
chip_gen: v5e
topology: v5e:2x2
jax: 0.10.0
libtpu: 0.0.40
codegen_flags: <defaults>
</compile_context>

<pallas_src>
import jax
import jax.numpy as jnp
from jax.experimental import pallas as pl
from jax.experimental.pallas import tpu as pltpu


_TARGET_BLOCK_BYTES = 2 << 20      # ~2 MiB: past the HBM roofline knee on all gens
_MIN_SHRINK_BYTES = 512 << 10      # don't shrink blocks below ~512 KiB for step count
_VMEM_FLOOR = 32 << 20
_VMEM_CEIL = 56 << 20              # stay well under v7x's 64 MiB / TensorCore


def _cdiv(a: int, b: int) -> int:
    return -(-a // b)


# ---------------------------------------------------------------------------
# Kernels
# ---------------------------------------------------------------------------

def _make_kernel_flat(lambda_val: float, h: int, w: int):
    """Kernel for the natural (rows, H*W) view (small W): lane axis = H*W."""
    inv_h = 1.0 / h
    # H == 1 -> 0 * inf = NaN, matching PyTorch's 0/0 for d.sum()/0.
    inv_n = float("inf") if h == 1 else 1.0 / (h - 1)

    def sum_over_h(a):
        # a: (TB, width*w) -> (TB, w), summing the lanes that share the same w
        # index (lane index j = h_idx * w + w_idx). Tree of lane-slice adds:
        # the first halvings are vreg-aligned, the rest are cheap XLU lane
        # shifts; all hidden under the HBM DMA.
        width = h
        rem = None
        cur = a
        while width > 1:
            if width % 2 == 1:
                tail = cur[:, (width - 1) * w:]
                rem = tail if rem is None else rem + tail
                cur = cur[:, : (width - 1) * w]
                width -= 1
            half = (width // 2) * w
            cur = cur[:, :half] + cur[:, half:]
            width //= 2
        return cur if rem is None else cur + rem

    def kernel(x_ref, o_ref):
        x = x_ref[...].astype(jnp.float32)                       # (TB, H*W)
        mean = sum_over_h(x) * inv_h                              # (TB, W)
        xm = x - jnp.tile(mean, (1, h))                           # (TB, H*W)
        d = xm * xm                                               # feeds both uses; fused pass
        v = sum_over_h(d) * inv_n                                 # (TB, W)
        inv_den = pl.reciprocal(4.0 * (v + lambda_val), approx=False)
        e_inv = d * jnp.tile(inv_den, (1, h)) + 0.5               # (TB, H*W)
        o_ref[...] = (x * jax.nn.sigmoid(e_inv)).astype(o_ref.dtype)

    return kernel


def _make_kernel_3d(lambda_val: float, h: int):
    """Kernel for the natural (rows, H, W) view (W >= 128): lanes = W tile."""
    inv_h = 1.0 / h
    inv_n = float("inf") if h == 1 else 1.0 / (h - 1)

    def kernel(x_ref, o_ref):
        x = x_ref[...].astype(jnp.float32)                        # (TB, H, TW)
        mean = jnp.sum(x, axis=1, keepdims=True) * inv_h          # (TB, 1, TW)
        xm = x - mean
        d = xm * xm
        v = jnp.sum(d, axis=1, keepdims=True) * inv_n             # (TB, 1, TW)
        inv_den = pl.reciprocal(4.0 * (v + lambda_val), approx=False)
        e_inv = d * inv_den + 0.5
        o_ref[...] = (x * jax.nn.sigmoid(e_inv)).astype(o_ref.dtype)

    return kernel


# ---------------------------------------------------------------------------
# Block sizing helpers
# ---------------------------------------------------------------------------

def _pick_row_block(rows: int, row_bytes: int, min_steps: int = 8) -> int:
    """Rows per (TB, L) block: multiple of 8 (sublane tile) unless full."""
    if rows <= 8:
        return rows
    tb = max(8, min(rows, (_TARGET_BLOCK_BYTES // max(1, row_bytes)) // 8 * 8))
    want = min(min_steps, _cdiv(rows, 8))
    # Prefer >= `want` grid steps (pipeline depth + v7x 2-TC balance) as long
    # as blocks stay >= 8 rows and >= ~512 KiB.
    while tb > 8 and _cdiv(rows, tb) < want and tb * row_bytes > _MIN_SHRINK_BYTES:
        tb = max(8, (tb // 2) // 8 * 8)
    return tb


def _pick_lead_block(rows: int, row_bytes: int, min_steps: int = 4) -> int:
    """Leading-dim rows per (TB, H, TW) block (no sublane-tiling constraint)."""
    tb = max(1, min(rows, _TARGET_BLOCK_BYTES // max(1, row_bytes)))
    want = min(min_steps, rows)
    while tb > 1 and _cdiv(rows, tb) < want and tb * row_bytes > _MIN_SHRINK_BYTES:
        tb = max(1, tb // 2)
    return tb


def _compiler_params(n_parallel_axes: int, block_bytes: int) -> pltpu.CompilerParams:
    # 2x-in + 2x-out double buffers plus a handful of block-sized f32
    # temporaries; modest cap keeps v7x (64 MiB / TC) comfortable.
    vmem = min(_VMEM_CEIL, max(_VMEM_FLOOR, 16 * block_bytes))
    return pltpu.CompilerParams(
        dimension_semantics=("parallel",) * n_parallel_axes,
        vmem_limit_bytes=int(vmem),
    )


# ---------------------------------------------------------------------------
# Public entry point
# ---------------------------------------------------------------------------

def simam(x: jax.Array, lambda_val: float = 1e-4) -> jax.Array:
    """SimAM forward. x: (N, C, H, W), NCHW layout (f32 or bf16)."""
    N, C, H, W = x.shape
    B = N * C
    itemsize = jnp.dtype(x.dtype).itemsize

    if W >= 128:
        # Natural (B, H, W) view (free bitcast): W tiles on lanes (multiples of
        # 128 -> unmasked vst), H on sublanes, a batch of rows per block.
        tw = 128
        while tw * 2 <= W and H * (tw * 2) * itemsize <= (_TARGET_BLOCK_BYTES // 2):
            tw *= 2
        row_bytes = H * tw * itemsize
        tb = _pick_lead_block(B, row_bytes)
        block_bytes = tb * row_bytes
        x3 = x.reshape(B, H, W)
        out = pl.pallas_call(
            _make_kernel_3d(float(lambda_val), H),
            out_shape=jax.ShapeDtypeStruct((B, H, W), x.dtype),
            grid_spec=pltpu.PrefetchScalarGridSpec(
                num_scalar_prefetch=0,
                grid=(_cdiv(B, tb), _cdiv(W, tw)),
                in_specs=[pl.BlockSpec((tb, H, tw), lambda i, j: (i, 0, j))],
                out_specs=pl.BlockSpec((tb, H, tw), lambda i, j: (i, 0, j)),
            ),
            compiler_params=_compiler_params(2, block_bytes),
        )(x3)
        return out.reshape(N, C, H, W)

    # Small W: natural (B, H*W) view (free bitcast) keeps lanes dense; the
    # strided reduction over H is done on-chip inside the kernel.
    L = H * W
    row_bytes = L * itemsize
    tb = _pick_row_block(B, row_bytes)
    block_bytes = tb * row_bytes
    x2 = x.reshape(B, L)
    out = pl.pallas_call(
        _make_kernel_flat(float(lambda_val), H, W),
        out_shape=jax.ShapeDtypeStruct((B, L), x.dtype),
        grid_spec=pltpu.PrefetchScalarGridSpec(
            num_scalar_prefetch=0,
            grid=(_cdiv(B, tb),),
            in_specs=[pl.BlockSpec((tb, L), lambda i: (i, 0))],
            out_specs=pl.BlockSpec((tb, L), lambda i: (i, 0)),
        ),
        compiler_params=_compiler_params(1, block_bytes),
    )(x2)
    return out.reshape(N, C, H, W)


def simam_ref(x: jax.Array, lambda_val: float = 1e-4) -> jax.Array:
    """Pure-JAX reference matching the PyTorch forward exactly."""
    n = x.shape[2] - 1
    d = (x - jnp.mean(x, axis=2, keepdims=True)) ** 2
    v = jnp.sum(d, axis=2, keepdims=True) / n
    e_inv = d / (4.0 * (v + lambda_val)) + 0.5
    return x * jax.nn.sigmoid(e_inv)


if __name__ == "__main__":
    key = jax.random.PRNGKey(0)

    # Small-W path (the typical SimAM feature-map shape).
    x = jax.random.normal(key, (2, 4, 16, 16), dtype=jnp.float32)
    out = jax.block_until_ready(simam(x, lambda_val=1e-4))
    ref = simam_ref(x, lambda_val=1e-4)
    assert out.shape == x.shape and out.dtype == x.dtype
    assert jnp.allclose(out, ref, atol=1e-5, rtol=1e-5), "mismatch (small-W path)"

    # Wide-W path (W >= 128, lane-dense natural layout).
    xw = jax.random.normal(jax.random.PRNGKey(1), (2, 2, 8, 128), dtype=jnp.float32)
    outw = jax.block_until_ready(simam(xw, lambda_val=1e-4))
    refw = simam_ref(xw, lambda_val=1e-4)
    assert outw.shape == xw.shape and outw.dtype == xw.dtype
    assert jnp.allclose(outw, refw, atol=1e-5, rtol=1e-5), "mismatch (wide-W path)"

    print("KERNEL_OK")
</pallas_src>

<mosaic_0001>
module attributes {stable_mosaic.version = 11 : i64} {
  func.func @kernel(%arg0: i32, %arg1: memref<8x256xf32, #tpu.memory_space<vmem>>, %arg2: memref<8x256xf32, #tpu.memory_space<vmem>>) attributes {dimension_semantics = [#tpu.dimension_semantics<parallel>], iteration_bounds = array<i64: 1>, scalar_prefetch = 0 : i64, scratch_operands = 0 : i64, tpu.core_type = #tpu.core_type<tc>, window_params = [{transform_indices = @transform_0, window_bounds = array<i64: 8, 256>}, {transform_indices = @transform_1, window_bounds = array<i64: 8, 256>}]} {
    %c0 = arith.constant 0 : index
    %c0_0 = arith.constant 0 : index
    %0 = vector.load %arg1[%c0, %c0_0] : memref<8x256xf32, #tpu.memory_space<vmem>>, vector<8x256xf32>
    %1 = vector.extract_strided_slice %0 {offsets = [0, 0], sizes = [8, 128], strides = [1, 1]} : vector<8x256xf32> to vector<8x128xf32>
    %2 = vector.extract_strided_slice %0 {offsets = [0, 128], sizes = [8, 128], strides = [1, 1]} : vector<8x256xf32> to vector<8x128xf32>
    %3 = arith.addf %1, %2 : vector<8x128xf32>
    %4 = vector.extract_strided_slice %3 {offsets = [0, 0], sizes = [8, 64], strides = [1, 1]} : vector<8x128xf32> to vector<8x64xf32>
    %5 = vector.extract_strided_slice %3 {offsets = [0, 64], sizes = [8, 64], strides = [1, 1]} : vector<8x128xf32> to vector<8x64xf32>
    %6 = arith.addf %4, %5 : vector<8x64xf32>
    %7 = vector.extract_strided_slice %6 {offsets = [0, 0], sizes = [8, 32], strides = [1, 1]} : vector<8x64xf32> to vector<8x32xf32>
    %8 = vector.extract_strided_slice %6 {offsets = [0, 32], sizes = [8, 32], strides = [1, 1]} : vector<8x64xf32> to vector<8x32xf32>
    %9 = arith.addf %7, %8 : vector<8x32xf32>
    %10 = vector.extract_strided_slice %9 {offsets = [0, 0], sizes = [8, 16], strides = [1, 1]} : vector<8x32xf32> to vector<8x16xf32>
    %11 = vector.extract_strided_slice %9 {offsets = [0, 16], sizes = [8, 16], strides = [1, 1]} : vector<8x32xf32> to vector<8x16xf32>
    %12 = arith.addf %10, %11 : vector<8x16xf32>
    %cst = arith.constant 6.250000e-02 : f32
    %13 = vector.broadcast %cst : f32 to vector<8x16xf32>
    %14 = arith.mulf %12, %13 : vector<8x16xf32>
    %15 = tpu.concatenate %14, %14, %14, %14, %14, %14, %14, %14, %14, %14, %14, %14, %14, %14, %14, %14 in 1 : vector<8x16xf32>, vector<8x16xf32>, vector<8x16xf32>, vector<8x16xf32>, vector<8x16xf32>, vector<8x16xf32>, vector<8x16xf32>, vector<8x16xf32>, vector<8x16xf32>, vector<8x16xf32>, vector<8x16xf32>, vector<8x16xf32>, vector<8x16xf32>, vector<8x16xf32>, vector<8x16xf32>, vector<8x16xf32> -> vector<8x256xf32>
    %16 = arith.subf %0, %15 : vector<8x256xf32>
    %17 = arith.mulf %16, %16 : vector<8x256xf32>
    %18 = vector.extract_strided_slice %17 {offsets = [0, 0], sizes = [8, 128], strides = [1, 1]} : vector<8x256xf32> to vector<8x128xf32>
    %19 = vector.extract_strided_slice %17 {offsets = [0, 128], sizes = [8, 128], strides = [1, 1]} : vector<8x256xf32> to vector<8x128xf32>
    %20 = arith.addf %18, %19 : vector<8x128xf32>
    %21 = vector.extract_strided_slice %20 {offsets = [0, 0], sizes = [8, 64], strides = [1, 1]} : vector<8x128xf32> to vector<8x64xf32>
    %22 = vector.extract_strided_slice %20 {offsets = [0, 64], sizes = [8, 64], strides = [1, 1]} : vector<8x128xf32> to vector<8x64xf32>
    %23 = arith.addf %21, %22 : vector<8x64xf32>
    %24 = vector.extract_strided_slice %23 {offsets = [0, 0], sizes = [8, 32], strides = [1, 1]} : vector<8x64xf32> to vector<8x32xf32>
    %25 = vector.extract_strided_slice %23 {offsets = [0, 32], sizes = [8, 32], strides = [1, 1]} : vector<8x64xf32> to vector<8x32xf32>
    %26 = arith.addf %24, %25 : vector<8x32xf32>
    %27 = vector.extract_strided_slice %26 {offsets = [0, 0], sizes = [8, 16], strides = [1, 1]} : vector<8x32xf32> to vector<8x16xf32>
    %28 = vector.extract_strided_slice %26 {offsets = [0, 16], sizes = [8, 16], strides = [1, 1]} : vector<8x32xf32> to vector<8x16xf32>
    %29 = arith.addf %27, %28 : vector<8x16xf32>
    %cst_1 = arith.constant 0.0666666701 : f32
    %30 = vector.broadcast %cst_1 : f32 to vector<8x16xf32>
    %31 = arith.mulf %29, %30 : vector<8x16xf32>
    %cst_2 = arith.constant 9.99999974E-5 : f32
    %32 = vector.broadcast %cst_2 : f32 to vector<8x16xf32>
    %33 = arith.addf %31, %32 : vector<8x16xf32>
    %cst_3 = arith.constant 4.000000e+00 : f32
    %34 = vector.broadcast %cst_3 : f32 to vector<8x16xf32>
    %35 = arith.mulf %34, %33 : vector<8x16xf32>
    %36 = tpu.reciprocal %35 : vector<8x16xf32> -> vector<8x16xf32>
    %37 = tpu.concatenate %36, %36, %36, %36, %36, %36, %36, %36, %36, %36, %36, %36, %36, %36, %36, %36 in 1 : vector<8x16xf32>, vector<8x16xf32>, vector<8x16xf32>, vector<8x16xf32>, vector<8x16xf32>, vector<8x16xf32>, vector<8x16xf32>, vector<8x16xf32>, vector<8x16xf32>, vector<8x16xf32>, vector<8x16xf32>, vector<8x16xf32>, vector<8x16xf32>, vector<8x16xf32>, vector<8x16xf32>, vector<8x16xf32> -> vector<8x256xf32>
    %38 = arith.mulf %17, %37 : vector<8x256xf32>
    %cst_4 = arith.constant 5.000000e-01 : f32
    %39 = vector.broadcast %cst_4 : f32 to vector<8x256xf32>
    %40 = arith.addf %38, %39 : vector<8x256xf32>
    %41 = arith.negf %40 : vector<8x256xf32>
    %42 = math.exp %41 : vector<8x256xf32>
    %cst_5 = arith.constant 1.000000e+00 : f32
    %43 = vector.broadcast %cst_5 : f32 to vector<8x256xf32>
    %44 = arith.addf %43, %42 : vector<8x256xf32>
    %45 = arith.divf %43, %44 : vector<8x256xf32>
    %46 = arith.mulf %0, %45 : vector<8x256xf32>
    %c0_6 = arith.constant 0 : index
    %c0_7 = arith.constant 0 : index
    %47 = vector.load %arg2[%c0_6, %c0_7] : memref<8x256xf32, #tpu.memory_space<vmem>>, vector<8x256xf32>
    tpu.vector_store %arg2[%c0_6, %c0_7], %46 {strides = array<i32>} : memref<8x256xf32, #tpu.memory_space<vmem>>, vector<8x256xf32>,
    return
  }
  func.func @transform_0(%arg0: i32) -> (i32, i32) {
    %c0_i32 = arith.constant 0 : i32
    %c0_i32_0 = arith.constant 0 : i32
    return %arg0, %c0_i32 : i32, i32
  }
  func.func @transform_1(%arg0: i32) -> (i32, i32) {
    %c0_i32 = arith.constant 0 : i32
    %c0_i32_0 = arith.constant 0 : i32
    return %arg0, %c0_i32 : i32, i32
  }
}

</mosaic_0001>

<bundles_post_ra>
// kernel: tpu_custom_call.1
= control target key start
LH: loop header
LB: loop body
LE: loop exit
PB: predicated region body
PF: predicated region fallthrough
CT: control target
= control target key end

     0   :  { %6 = vsyncpa [#allocation3], 0  ;;  %s349_s0 = inlined_call_operand.hbm [shape: f32[8,256], index: 0, kind: input, shape index: {}]   ;;  %s350_s1 = inlined_call_operand.hbm [shape: f32[8,256], index: 1, kind: output, shape index: {}]  }
   0x1   :  { %7 = vsyncpa [#allocation4], 0  ;;  %s13_s8 = sshll.u32 %s349_s0, 4  ;;  %s280_s9 = smov [#allocation2]   ;;  %s14_s8 = int_to_ptr.hbm [resolvable:$true] %s13_s8 }
   0x2   :  { %s15_s10 = sshll.u32 %s280_s9, 4  ;;  %s16_s10 = int_to_ptr.vmem [resolvable:$true] %s15_s10 }
   0x3   :  { %18 = dma.hbm_to_vmem [thread:$0]  %s14_s8, 256, %s16_s10, [#allocation3]  }
   0x4   :  { %276 = dma.done.wait [#allocation3], 256  }
   0x5   :  { %277 = vsyncadd [#allocation3], 4294967040  ;;  %v302_v0 = vld [vmem:[#allocation2] sm:$0xff]  ;;  %v304_v1 = vld [vmem:[#allocation2 + $0x8] sm:$0xff]  ;;  %s281_s11 = smov 64   ;;  %s282_s0 = smov 96  }
   0x6   :  { %v25_v2 = vadd.f32 %v304_v1, %v302_v0  ;;  %s283_s12 = smov 112   ;;  %s284_s13 = smov 32   ;;  %vm64_vm0 = vcmask 130048   ;;  %vm66_vm1 = vcmask 261120   ;;  %vm68_vm2 = vcmask 392192  }
   0x7   :  { %s285_s14 = smov 16   ;;  %s286_s15 = smov 48   ;;  %vm70_vm3 = vcmask 523264   ;;  %vm72_vm4 = vcmask 654336   ;;  %vm74_vm5 = vcmask 785408   ;;  %vm76_vm6 = vcmask 916480  }
   0x8   :  { %27 = vrot.lane.b32.xlu0 %v25_v2, %s281_s11  ;;  %s287_s16 = smov 80   ;;  %s288_s17 = smov [#allocation5]  }
   0x9   :  { %s195_s18 = sshll.u32 %s288_s17, 4  ;;  %s197_s21 = sshll.u32 %s350_s1, 4  ;;  %s196_s18 = int_to_ptr.vmem [resolvable:$true] %s195_s18  ;;  %s198_s21 = int_to_ptr.hbm [resolvable:$true] %s197_s21 }
  0x7a   :  { %v28_v3 = vpop.permute.xlu0 %27 }
  0x7b   :  { %v30_v4 = vadd.f32 %v28_v3, %v25_v2 }
  0x7d   :  { %32 = vrot.lane.b32.xlu0 %v30_v4, %s282_s0 }
  0xef   :  { %v33_v5 = vpop.permute.xlu0 %32 }
  0xf0   :  { %v35_v6 = vadd.f32 %v33_v5, %v30_v4 }
  0xf2   :  { %37 = vrot.lane.b32.xlu1 %v35_v6, %s283_s12 }
 0x164   :  { %v38_v7 = vpop.permute.xlu1 %37 }
 0x165   :  { %v40_v8 = vadd.f32 %v38_v7, %v35_v6 }
 0x167   :  { %v41_v9 = vmul.f32 0.0625, %v40_v8 }
 0x169   :  { %52 = vrot.lane.b32.xlu0 %v41_v9, %s281_s11  ;;  %46 = vrot.lane.b32.xlu2 %v41_v9, %s284_s13 }
 0x16a   :  { %43 = vrot.lane.b32.xlu1 %v41_v9, %s285_s14 }
 0x171   :  { %61 = vrot.lane.b32.xlu0 %v41_v9, %s283_s12  ;;  %49 = vrot.lane.b32.xlu2 %v41_v9, %s286_s15 }
 0x172   :  { %55 = vrot.lane.b32.xlu1 %v41_v9, %s287_s16 }
 0x179   :  { %58 = vrot.lane.b32.xlu2 %v41_v9, %s282_s0 }
 0x1c3   :  { %v47_v10 = vpop.permute.xlu2 %46 }
 0x1cb   :  { %v50_v11 = vpop.permute.xlu2 %49 }
 0x1d3   :  { %v59_v19 = vpop.permute.xlu2 %58 }
 0x1db   :  { %v53_v12 = vpop.permute.xlu0 %52 }
 0x1dc   :  { %v44_v13 = vpop.permute.xlu1 %43 }
 0x1dd   :  { %v65_v14 = vsel %vm64_vm0, %v41_v9, %v44_v13 }
 0x1de   :  { %v67_v15 = vsel %vm66_vm1, %v65_v14, %v47_v10 }
 0x1df   :  { %v69_v16 = vsel %vm68_vm2, %v67_v15, %v50_v11 }
 0x1e0   :  { %v71_v17 = vsel %vm70_vm3, %v69_v16, %v53_v12 }
 0x1e3   :  { %v62_v21 = vpop.permute.xlu0 %61 }
 0x1e4   :  { %v56_v18 = vpop.permute.xlu1 %55 }
 0x1e5   :  { %v73_v20 = vsel %vm72_vm4, %v71_v17, %v56_v18 }
 0x1e6   :  { %v75_v22 = vsel %vm74_vm5, %v73_v20, %v59_v19 }
 0x1e7   :  { %v77_v23 = vsel %vm76_vm6, %v75_v22, %v62_v21 }
 0x1e8   :  { %v78_v24 = vsub.f32 %v302_v0, %v77_v23  ;;  %v79_v25 = vsub.f32 %v304_v1, %v77_v23 }
 0x1ea   :  { %v80_v26 = vmul.f32 %v78_v24, %v78_v24  ;;  %v81_v27 = vmul.f32 %v79_v25, %v79_v25 }
 0x1ec   :  { %v82_v28 = vadd.f32 %v81_v27, %v80_v26 }
 0x1ee   :  { %84 = vrot.lane.b32.xlu1 %v82_v28, %s281_s11 }
 0x260   :  { %v85_v29 = vpop.permute.xlu1 %84 }
 0x261   :  { %v87_v30 = vadd.f32 %v85_v29, %v82_v28 }
 0x263   :  { %89 = vrot.lane.b32.xlu2 %v87_v30, %s282_s0 }
 0x2bd   :  { %v90_v31 = vpop.permute.xlu2 %89 }
 0x2be   :  { %v92_v32 = vadd.f32 %v90_v31, %v87_v30 }
 0x2c0   :  { %94 = vrot.lane.b32.xlu0 %v92_v32, %s283_s12 }
 0x332   :  { %v95_v33 = vpop.permute.xlu0 %94 }
 0x333   :  { %v97_v34 = vadd.f32 %v95_v33, %v92_v32 }
 0x335   :  { %v98_v35 = vmul.f32 0.06666667, %v97_v34 }
 0x337   :  { %v99_v36 = vadd.f32 0.0001, %v98_v35 }
 0x339   :  { %v100_v37 = vmul.f32 4.0, %v99_v36 }
 0x33b   :  { %218 = vrcp.f32 %v100_v37  ;;  %v112_v41 = vand.u32 2147483648, %v100_v37  ;;  %v110_v43 = vand.u32 2147483647, %v100_v37  ;;  %vm106_vm8 = vweird.f32 %v100_v37 }
 0x33d   :  { %v113_v45 = vor.u32 1.1754944e-38, %v112_v41  ;;  %vm111_vm10 = vcmp.eq.f32.partialorder %v110_v43, 8.507059e+37 }
 0x341   :  { %v219_v38 = vpop.eup %218 }
 0x342   :  { %v102_v39 = vmul.f32 %v219_v38, %v100_v37  ;;  %vm107_vm7 = vweird.f32 %v219_v38 }
 0x343   :  { %vm108_vm9 = vmor %vm106_vm8, %vm107_vm7 }
 0x344   :  { %v103_v40 = vsub.f32 1.0, %v102_v39 }
 0x346   :  { %v104_v42 = vmul.f32 %v219_v38, %v103_v40 }
 0x348   :  { %v105_v44 = vadd.f32 %v219_v38, %v104_v42 }
 0x34a   :  { %v109_v46 = vsel %vm108_vm9, %v219_v38, %v105_v44 }
 0x34b   :  { %v114_v47 = vsel %vm111_vm10, %v113_v45, %v109_v46 }
 0x34c   :  { %122 = vrot.lane.b32.xlu0 %v114_v47, %s286_s15  ;;  %119 = vrot.lane.b32.xlu2 %v114_v47, %s284_s13 }
 0x34d   :  { %116 = vrot.lane.b32.xlu1 %v114_v47, %s285_s14 }
 0x354   :  { %131 = vrot.lane.b32.xlu0 %v114_v47, %s282_s0  ;;  %128 = vrot.lane.b32.xlu2 %v114_v47, %s287_s16 }
 0x355   :  { %125 = vrot.lane.b32.xlu1 %v114_v47, %s281_s11 }
 0x35d   :  { %134 = vrot.lane.b32.xlu1 %v114_v47, %s283_s12 }
 0x3a6   :  { %v120_v49 = vpop.permute.xlu2 %119 }
 0x3ae   :  { %v129_v56 = vpop.permute.xlu2 %128 }
 0x3be   :  { %v123_v51 = vpop.permute.xlu0 %122 }
 0x3bf   :  { %v117_v48 = vpop.permute.xlu1 %116 }
 0x3c0   :  { %v137_v50 = vsel %vm64_vm0, %v114_v47, %v117_v48 }
 0x3c1   :  { %v138_v52 = vsel %vm66_vm1, %v137_v50, %v120_v49 }
 0x3c2   :  { %v139_v54 = vsel %vm68_vm2, %v138_v52, %v123_v51 }
 0x3c6   :  { %v132_v58 = vpop.permute.xlu0 %131 }
 0x3c7   :  { %v126_v53 = vpop.permute.xlu1 %125 }
 0x3c8   :  { %v140_v55 = vsel %vm70_vm3, %v139_v54, %v126_v53 }
 0x3c9   :  { %v141_v57 = vsel %vm72_vm4, %v140_v55, %v129_v56 }
 0x3ca   :  { %v142_v59 = vsel %vm74_vm5, %v141_v57, %v132_v58 }
 0x3cf   :  { %v135_v60 = vpop.permute.xlu1 %134 }
 0x3d0   :  { %v143_v61 = vsel %vm76_vm6, %v142_v59, %v135_v60 }
 0x3d1   :  { %v144_v62 = vmul.f32 %v143_v61, %v80_v26  ;;  %v145_v63 = vmul.f32 %v143_v61, %v81_v27 }
 0x3d3   :  { %v146_v2 = vadd.f32 0.5, %v144_v62  ;;  %v147_v3 = vadd.f32 0.5, %v145_v63 }
 0x3d5   :  { %v207_v4 = vmul.f32 -1.442695, %v146_v2  ;;  %v208_v5 = vmul.f32 -1.442695, %v147_v3 }
 0x3d7   :  { %220 = vpow2.f32 %v207_v4 }
 0x3d8   :  { %222 = vpow2.f32 %v208_v5 }
 0x3dd   :  { %v221_v6 = vpop.eup %220 }
 0x3de   :  { %v223_v7 = vpop.eup %222  ;;  %v154_v8 = vadd.f32 1.0, %v221_v6 }
 0x3df   :  { %v155_v9 = vadd.f32 1.0, %v223_v7 }
 0x3e0   :  { %224 = vrcp.f32 %v154_v8  ;;  %v167_v16 = vand.u32 2147483648, %v154_v8  ;;  %v165_v18 = vand.u32 2147483647, %v154_v8  ;;  %vm161_vm13 = vweird.f32 %v154_v8 }
 0x3e1   :  { %226 = vrcp.f32 %v155_v9  ;;  %v182_v19 = vand.u32 2147483648, %v155_v9  ;;  %v180_v21 = vand.u32 2147483647, %v155_v9  ;;  %vm176_vm15 = vweird.f32 %v155_v9 }
 0x3e2   :  { %v168_v23 = vor.u32 1.1754944e-38, %v167_v16  ;;  %vm166_vm0 = vcmp.eq.f32.partialorder %v165_v18, 8.507059e+37 }
 0x3e3   :  { %v183_v26 = vor.u32 1.1754944e-38, %v182_v19  ;;  %vm181_vm2 = vcmp.eq.f32.partialorder %v180_v21, 8.507059e+37 }
 0x3e6   :  { %v225_v10 = vpop.eup %224 }
 0x3e7   :  { %v227_v11 = vpop.eup %226  ;;  %v157_v12 = vmul.f32 %v225_v10, %v154_v8  ;;  %vm162_vm11 = vweird.f32 %v225_v10 }
 0x3e8   :  { %v172_v13 = vmul.f32 %v227_v11, %v155_v9  ;;  %vm177_vm12 = vweird.f32 %v227_v11  ;;  %vm163_vm14 = vmor %vm161_vm13, %vm162_vm11 }
 0x3e9   :  { %v158_v14 = vsub.f32 1.0, %v157_v12  ;;  %vm178_vm1 = vmor %vm176_vm15, %vm177_vm12 }
 0x3ea   :  { %v173_v15 = vsub.f32 1.0, %v172_v13 }
 0x3eb   :  { %v159_v17 = vmul.f32 %v225_v10, %v158_v14 }
 0x3ec   :  { %v174_v20 = vmul.f32 %v227_v11, %v173_v15 }
 0x3ed   :  { %v160_v22 = vadd.f32 %v225_v10, %v159_v17 }
 0x3ee   :  { %v175_v24 = vadd.f32 %v227_v11, %v174_v20 }
 0x3ef   :  { %v164_v25 = vsel %vm163_vm14, %v225_v10, %v160_v22 }
 0x3f0   :  { %v169_v27 = vsel %vm166_vm0, %v168_v23, %v164_v25  ;;  %v179_v28 = vsel %vm178_vm1, %v227_v11, %v175_v24 }
 0x3f1   :  { %v184_v29 = vsel %vm181_vm2, %v183_v26, %v179_v28  ;;  %v186_v30 = vmul.f32 %v169_v27, %v302_v0 }
 0x3f2   :  { %v187_v31 = vmul.f32 %v184_v29, %v304_v1 }
 0x3f3   :  { %188 = vst [vmem:[#allocation5] sm:$0xff] %v186_v30 }
 0x3f4   :  { %189 = vst [vmem:[#allocation5 + $0x8] sm:$0xff] %v187_v31 }
 0x3f5   :  { %200 = dma.vmem_to_hbm [thread:$0]  %s196_s18, 256, %s198_s21, [#allocation4]  }
 0x3f6   :  { %278 = dma.done.wait [#allocation4], 256  }
 0x3f7   :  { %279 = vsyncadd [#allocation4], 4294967040 }
 0x3f8   :  { %205 = vsyncpa [#allocation3], 1 }
 0x3f9   :  { %206 = vsyncpa [#allocation4], 1 }

</bundles_post_ra>
